<compile_context>
chip_gen: v6e
topology: v6e:2x2x1
jax: 0.10.0
libtpu: 0.0.40
codegen_flags: <defaults>
</compile_context>

<pallas_src>
import jax
import jax.numpy as jnp
from jax.experimental import pallas as pl
from jax.experimental.pallas import tpu as pltpu


def _round_up(x, m):
    return -(-x // m) * m


# ---------------------------------------------------------------------------
# Kernel: fused (BN-scaled) 1x1 conv + BN bias + SiLU on one [C2, Tp] tile.
# ---------------------------------------------------------------------------
def _focus_conv_kernel(x_ref, w_ref, b_ref, o_ref):
    """x_ref: [K, Tp] activations (K = 4*C1, Tp = pixel tile on the lane axis)
       w_ref: [C2, K]  conv weight with BatchNorm scale folded in (resident)
       b_ref: [C2, 1]  folded BatchNorm bias (float32)
       o_ref: [C2, Tp] output tile
    Only one MXU matmul + one VPU add + one EUP sigmoid per tile; all compute
    units have large slack — HBM bytes dominate, so nothing else is tuned here.
    """
    y = jnp.dot(w_ref[...], x_ref[...], preferred_element_type=jnp.float32)
    y = y + b_ref[...]                                        # BN bias, f32
    o_ref[...] = (y * jax.nn.sigmoid(y)).astype(o_ref.dtype)  # SiLU, cast at store


# ---------------------------------------------------------------------------
# Tile sizing & VMEM budgeting (portable across v5e / v6e / v7x).
# ---------------------------------------------------------------------------
def _vmem_estimate(K, C2, tp, stream_bytes, out_bytes):
    """Generous per-step VMEM working-set estimate (bytes)."""
    kp = _round_up(K, 16)
    cp = _round_up(C2, 16)
    return (2 * kp * tp * stream_bytes     # double-buffered activation tile
            + 2 * cp * tp * out_bytes      # double-buffered output tile
            + 2 * cp * kp * stream_bytes   # scaled weights (resident, dbl-buf alloc)
            + 2 * cp * 128 * 4             # BN bias (lane padded)
            + 4 * cp * tp * 4)             # f32 matmul / bias / SiLU temporaries


def _pick_pixel_tile(P, target, K, C2, stream_bytes, out_bytes,
                     working_set_budget=28 << 20):
    """Pick a lane-dense pixel tile:
       - fits a portable VMEM working-set budget (safe on v5e 16 MiB default
         scoped limit and v7x 64 MiB physical),
       - divides P exactly when possible (no masked-tail stores / wasted DMA),
       - gives an even step count so 2-TensorCore chips split the work evenly.
    """
    target = max(128, (target // 128) * 128)
    tp_cap = target
    while tp_cap > 128 and _vmem_estimate(K, C2, tp_cap, stream_bytes,
                                          out_bytes) > working_set_budget:
        tp_cap = max(128, ((tp_cap // 2) // 128) * 128)
    if P <= tp_cap:
        return P                                  # one full-width block (legal)
    steps = pl.cdiv(P, tp_cap)
    if steps % 2:                                 # even step count for megacore
        steps += 1
    tp = _round_up(pl.cdiv(P, steps), 128)
    return max(128, min(tp, tp_cap))


# ---------------------------------------------------------------------------
# pallas_call wrapper.
# ---------------------------------------------------------------------------
def _focus_conv_pallas(x_mat, w_scaled, bias, out_dtype, *, tile_pixels):
    """x_mat: [N, K, P], w_scaled: [C2, K], bias: [C2, 1] (f32) -> [N, C2, P]."""
    N, K, P = x_mat.shape
    C2 = w_scaled.shape[0]
    sb = x_mat.dtype.itemsize
    ob = jnp.dtype(out_dtype).itemsize

    tp = _pick_pixel_tile(P, tile_pixels, K, C2, sb, ob)
    grid = (N, pl.cdiv(P, tp))

    # Explicit scoped-VMEM limit: 2x the estimated working set, clamped to a
    # range that is legal on every generation (>= 32 MiB, <= v7x 64 MiB).
    vmem_limit = int(min(64 << 20,
                         max(32 << 20, 2 * _vmem_estimate(K, C2, tp, sb, ob))))

    cost = pl.CostEstimate(
        flops=2 * N * P * K * C2,
        transcendentals=N * P * C2,                 # sigmoid in SiLU
        bytes_accessed=(x_mat.size * sb + w_scaled.size * sb
                        + bias.size * bias.dtype.itemsize + N * C2 * P * ob))

    return pl.pallas_call(
        _focus_conv_kernel,
        out_shape=jax.ShapeDtypeStruct((N, C2, P), out_dtype),
        grid_spec=pltpu.PrefetchScalarGridSpec(
            num_scalar_prefetch=0,
            grid=grid,
            in_specs=[
                pl.BlockSpec((None, K, tp), lambda n, p: (n, 0, p)),  # activations
                pl.BlockSpec((C2, K), lambda n, p: (0, 0)),           # scaled weight
                pl.BlockSpec((C2, 1), lambda n, p: (0, 0)),           # BN bias (f32)
            ],
            out_specs=pl.BlockSpec((None, C2, tp), lambda n, p: (n, 0, p)),
        ),
        compiler_params=pltpu.CompilerParams(
            dimension_semantics=("parallel", "parallel"),
            vmem_limit_bytes=vmem_limit),
        cost_estimate=cost,
    )(x_mat, w_scaled, bias)


# ---------------------------------------------------------------------------
# Public forward.
# ---------------------------------------------------------------------------
def focus_forward(x_nchw, conv_w, bn_gamma, bn_beta, bn_mean, bn_var, *,
                  eps=1e-5, tile_pixels=16384, compute_dtype=None,
                  out_dtype=None):
    """Focus forward (inference).

    x_nchw: [N, C1, H, W] with even H, W.  conv_w: [C2, 4*C1, 1, 1].
    Returns [N, C2, H//2, W//2] in NCHW.

    compute_dtype: optional dtype for the HBM activation/weight streams
      (e.g. jnp.bfloat16 — recommended on v6e/v7x when the caller tolerates
      ~1e-2 deviation). Accumulation, BN bias add and SiLU stay float32.
    out_dtype: optional output dtype (defaults to the input dtype).
    """
    N, C1, H, W = x_nchw.shape
    assert H % 2 == 0 and W % 2 == 0, "Focus requires even spatial dims"
    C2 = conv_w.shape[0]
    Ho, Wo = H // 2, W // 2
    K = 4 * C1

    stream_dtype = jnp.dtype(x_nchw.dtype if compute_dtype is None else compute_dtype)
    out_dtype = jnp.dtype(x_nchw.dtype if out_dtype is None else out_dtype)

    # ---- space-to-depth, channel-first, as ONE transpose fusion:
    #      [N,C1,H,W] -> [N,C1,Ho,2,Wo,2] -> [N,2,2,C1,Ho,Wo] -> [N,4C1,Ho*Wo]
    # Cast to the stream dtype BEFORE the transpose so the materialized
    # intermediate is already narrow when compute_dtype=bf16.
    x5 = x_nchw.astype(stream_dtype).reshape(N, C1, Ho, 2, Wo, 2)
    x_mat = jnp.transpose(x5, (0, 3, 5, 1, 2, 4)).reshape(N, K, Ho * Wo)
    # TODO(synk): fuse this 2x2 pixel-unshuffle into the kernel itself
    # (strided DMA / in-kernel stride-2 slices from the raw NCHW input) to drop
    # the remaining HBM read+write of the 4*C1 activation; lane-stride-2 loads
    # are not reliably lowered by Mosaic today, so it stays host-side.

    # ---- fold BatchNorm: scale goes into the weights, bias stays float32.
    scale = (bn_gamma / jnp.sqrt(bn_var + eps)).astype(jnp.float32)
    bias = bn_beta.astype(jnp.float32) - bn_mean.astype(jnp.float32) * scale

    # Permute weight input channels to the (row-parity, col-parity, c1) order
    # produced by the transpose above. PyTorch concat order is
    # [(r0,c0), (r1,c0), (r0,c1), (r1,c1)]; new order is [(r0,c0),(r0,c1),(r1,c0),(r1,c1)].
    w4 = conv_w.reshape(C2, 4, C1).astype(jnp.float32)
    w4 = w4[:, jnp.array([0, 2, 1, 3]), :]
    w_scaled = (w4.reshape(C2, K) * scale[:, None]).astype(stream_dtype)

    out_mat = _focus_conv_pallas(x_mat, w_scaled, bias[:, None], out_dtype,
                                 tile_pixels=tile_pixels)
    return out_mat.reshape(N, C2, Ho, Wo)          # already NCHW, no transpose


# ---------------------------------------------------------------------------
# Pure-JAX reference (PyTorch channel order) for validation.
# ---------------------------------------------------------------------------
def focus_forward_ref(x_nchw, conv_w, bn_gamma, bn_beta, bn_mean, bn_var, eps=1e-5):
    tl = x_nchw[..., ::2, ::2]
    bl = x_nchw[..., 1::2, ::2]
    tr = x_nchw[..., ::2, 1::2]
    br = x_nchw[..., 1::2, 1::2]
    xc = jnp.concatenate([tl, bl, tr, br], axis=1)             # [N, 4C1, Ho, Wo]
    y = jnp.einsum("nchw,oc->nohw", xc, conv_w[:, :, 0, 0],
                   precision=jax.lax.Precision.HIGHEST)        # 1x1 conv, no bias
    scale = bn_gamma / jnp.sqrt(bn_var + eps)
    bias = bn_beta - bn_mean * scale
    y = y * scale[None, :, None, None] + bias[None, :, None, None]
    return y * jax.nn.sigmoid(y)


# ---------------------------------------------------------------------------
# Self-test.
# ---------------------------------------------------------------------------
def _run_case(key, N, C1, H, W, C2, *, tile_pixels=16384,
              compute_dtype=None, out_dtype=None, atol=2e-2, rtol=2e-2):
    k_x, k_w, k_g, k_b, k_m, k_v = jax.random.split(key, 6)
    x = jax.random.normal(k_x, (N, C1, H, W), dtype=jnp.float32)
    conv_w = jax.random.normal(k_w, (C2, 4 * C1, 1, 1), dtype=jnp.float32) / jnp.sqrt(4.0 * C1)
    bn_gamma = 1.0 + 0.1 * jax.random.normal(k_g, (C2,), dtype=jnp.float32)
    bn_beta = 0.1 * jax.random.normal(k_b, (C2,), dtype=jnp.float32)
    bn_mean = 0.05 * jax.random.normal(k_m, (C2,), dtype=jnp.float32)
    bn_var = 1.0 + 0.1 * jax.random.uniform(k_v, (C2,), dtype=jnp.float32)

    out = jax.block_until_ready(
        focus_forward(x, conv_w, bn_gamma, bn_beta, bn_mean, bn_var,
                      tile_pixels=tile_pixels, compute_dtype=compute_dtype,
                      out_dtype=out_dtype))
    ref = jax.block_until_ready(
        focus_forward_ref(x, conv_w, bn_gamma, bn_beta, bn_mean, bn_var))

    assert out.shape == (N, C2, H // 2, W // 2), out.shape
    out_f32 = out.astype(jnp.float32)
    err = float(jnp.max(jnp.abs(out_f32 - ref)))
    assert jnp.allclose(out_f32, ref, atol=atol, rtol=rtol), err


if __name__ == "__main__":
    key = jax.random.PRNGKey(0)
    k1, k2, k3 = jax.random.split(key, 3)

    # Small case matching the module spec (single pixel block, f32 streams).
    _run_case(k1, N=2, C1=4, H=16, W=16, C2=32)
    # Larger case exercising the multi-block pixel grid (4 lane-dense tiles).
    _run_case(k2, N=1, C1=3, H=64, W=64, C2=48, tile_pixels=256)
    # bf16 HBM streams + bf16 output (looser tolerance; compute stays f32).
    _run_case(k3, N=2, C1=4, H=16, W=16, C2=32,
              compute_dtype=jnp.bfloat16, out_dtype=jnp.bfloat16,
              atol=5e-2, rtol=5e-2)

    print("KERNEL_OK")
</pallas_src>

<mosaic_0001>
module attributes {stable_mosaic.version = 11 : i64} {
  func.func @_focus_conv_kernel(%arg0: i32, %arg1: i32, %arg2: memref<1x16x64xf32, #tpu.memory_space<vmem>>, %arg3: memref<32x16xf32, #tpu.memory_space<vmem>>, %arg4: memref<32x1xf32, #tpu.memory_space<vmem>>, %arg5: memref<1x32x64xf32, #tpu.memory_space<vmem>>) attributes {dimension_semantics = [#tpu.dimension_semantics<parallel>, #tpu.dimension_semantics<parallel>], iteration_bounds = array<i64: 2, 1>, scalar_prefetch = 0 : i64, scratch_operands = 0 : i64, tpu.core_type = #tpu.core_type<tc>, window_params = [{transform_indices = @transform_0, window_bounds = array<i64: 1, 16, 64>}, {pipeline_mode = #tpu.pipeline_mode<synchronous>, transform_indices = @transform_1, window_bounds = array<i64: 32, 16>}, {pipeline_mode = #tpu.pipeline_mode<synchronous>, transform_indices = @transform_2, window_bounds = array<i64: 32, 1>}, {transform_indices = @transform_3, window_bounds = array<i64: 1, 32, 64>}]} {
    %c0 = arith.constant 0 : index
    %c0_0 = arith.constant 0 : index
    %0 = vector.load %arg3[%c0, %c0_0] : memref<32x16xf32, #tpu.memory_space<vmem>>, vector<32x16xf32>
    %c0_1 = arith.constant 0 : index
    %c0_2 = arith.constant 0 : index
    %c0_3 = arith.constant 0 : index
    %1 = vector.load %arg2[%c0_1, %c0_2, %c0_3] : memref<1x16x64xf32, #tpu.memory_space<vmem>>, vector<1x16x64xf32>
    %2 = vector.shape_cast %1 : vector<1x16x64xf32> to vector<16x64xf32>
    %cst = arith.constant dense<0.000000e+00> : vector<32x64xf32>
    %3 = tpu.matmul %0, %2, %cst {dimension_numbers = #tpu.dot_dimension_numbers<[1], [0], [0], [1], [0, 0, 1, 1], [], []>} : vector<32x16xf32>, vector<16x64xf32>, vector<32x64xf32> -> vector<32x64xf32>
    %c0_4 = arith.constant 0 : index
    %c0_5 = arith.constant 0 : index
    %4 = vector.load %arg4[%c0_4, %c0_5] : memref<32x1xf32, #tpu.memory_space<vmem>>, vector<32x1xf32>
    %5 = vector.broadcast %4 : vector<32x1xf32> to vector<32x64xf32>
    %6 = arith.addf %3, %5 : vector<32x64xf32>
    %7 = arith.negf %6 : vector<32x64xf32>
    %8 = math.exp %7 : vector<32x64xf32>
    %cst_6 = arith.constant 1.000000e+00 : f32
    %9 = vector.broadcast %cst_6 : f32 to vector<32x64xf32>
    %10 = arith.addf %9, %8 : vector<32x64xf32>
    %11 = arith.divf %9, %10 : vector<32x64xf32>
    %12 = arith.mulf %6, %11 : vector<32x64xf32>
    %c0_7 = arith.constant 0 : index
    %c0_8 = arith.constant 0 : index
    %c0_9 = arith.constant 0 : index
    %13 = vector.load %arg5[%c0_7, %c0_8, %c0_9] : memref<1x32x64xf32, #tpu.memory_space<vmem>>, vector<1x32x64xf32>
    %14 = vector.shape_cast %13 : vector<1x32x64xf32> to vector<32x64xf32>
    %15 = vector.shape_cast %12 : vector<32x64xf32> to vector<1x32x64xf32>
    tpu.vector_store %arg5[%c0_7, %c0_8, %c0_9], %15 {strides = array<i32>} : memref<1x32x64xf32, #tpu.memory_space<vmem>>, vector<1x32x64xf32>,
    return
  }
  func.func @transform_0(%arg0: i32, %arg1: i32) -> (i32, i32, i32) {
    %c0_i32 = arith.constant 0 : i32
    %c0_i32_0 = arith.constant 0 : i32
    return %arg0, %c0_i32, %arg1 : i32, i32, i32
  }
  func.func @transform_1(%arg0: i32, %arg1: i32) -> (i32, i32) {
    %c0_i32 = arith.constant 0 : i32
    %c0_i32_0 = arith.constant 0 : i32
    %c0_i32_1 = arith.constant 0 : i32
    return %c0_i32, %c0_i32_0 : i32, i32
  }
  func.func @transform_2(%arg0: i32, %arg1: i32) -> (i32, i32) {
    %c0_i32 = arith.constant 0 : i32
    %c0_i32_0 = arith.constant 0 : i32
    %c0_i32_1 = arith.constant 0 : i32
    return %c0_i32, %c0_i32_0 : i32, i32
  }
  func.func @transform_3(%arg0: i32, %arg1: i32) -> (i32, i32, i32) {
    %c0_i32 = arith.constant 0 : i32
    %c0_i32_0 = arith.constant 0 : i32
    return %arg0, %c0_i32, %arg1 : i32, i32, i32
  }
}

</mosaic_0001>

<bundles_post_ra>
// kernel: tpu_custom_call.1
= control target key start
LH: loop header
LB: loop body
LE: loop exit
PB: predicated region body
PF: predicated region fallthrough
CT: control target
= control target key end

     0   :  { %8 = vsyncpa [#allocation3], 0  ;;  %s815_s0 = inlined_call_operand.vmem [shape: f32[2,16,64], index: 0, kind: input, shape index: {}]   ;;  %s816_s1 = inlined_call_operand.vmem [shape: f32[32,16], index: 1, kind: input, shape index: {}]   ;;  %s817_s2 = inlined_call_operand.vmem [shape: f32[32,1], index: 2, kind: input, shape index: {}]   ;;  %s818_s3 = inlined_call_operand.hbm [shape: f32[2,32,64], index: 3, kind: output, shape index: {}]  }
   0x1   :  { %10 = vsyncpa [#allocation3 + $0x1], 0  ;;  %s669_s12 = smov 0   ;;  %s671_s13 = smov 0  }
   0x2   :  { %s673_s14 = smov 0   ;;  %s675_s15 = smov 0  }
   0x3   :  { %s677_s16 = smov 0   ;;  %s679_s17 = smov 0  }
   0x4 LB: > { %s448_s18 = sadd.s32 4294967295, %s643_s17   ;;  %s449_s19 = sadd.s32 4294967294, %s643_s17   ;;  %s643_s17 = sphi %s679_s17, %s16_s17   ;;  %s639_s16 = sphi %s677_s16, %s825_s16   ;;  %s635_s15 = sphi %s675_s15, %s824_s15   ;;  %s631_s14 = sphi %s673_s14, %s823_s14   ;;  %s627_s13 = sphi %s671_s13, %s822_s13   ;;  %s623_s12 = sphi %s669_s12, %s821_s12  }
   0x5   : > { %s28_s20 = sadd.s32 1, %s639_s16  ;;  %s107_s21 = sadd.s32 1, %s631_s14 }
   0x6   : > { %p30_p0 = scmp.ge.s32.totalorder %s28_s20, 2  ;;  %p117_p1 = scmp.ne.s32.totalorder %s631_s14, %s627_s13 }
   0x7   : > { %p118_p2 = scmp.eq.s32.totalorder %s448_s18, 1  ;;  %p123_p3 = scmp.ne.s32.totalorder %s627_s13, %s623_s12 }
   0x8   : > { %s827_s20 = smov (%p30_p0, %s28_s20), 0  ;;  %p124_p5 = scmp.eq.s32.totalorder %s449_s19, 1 }
   0x9   : > { %p709_p4 = por %p118_p2, %p117_p1  ;;  %s102_s23 = ssub.s32 %s639_s16, %s827_s20 }
   0xa   : > { %p452_p6 = scmp.ge.s32.totalorder %s643_s17, 1  ;;  %p105_p7 = scmp.eq.s32.totalorder %s102_s23, 0 }
   0xb   : > { %p716_p8 = por %p124_p5, %p123_p3  ;;  %p159_p9 = scmp.lt.s32.totalorder %s643_s17, 3 }
   0xc   : > { %s722_s25 = scalar_select %p105_p7, %s631_s14, %s107_s21  }
   0xd   : > { %p160_p10 = pnand %p452_p6, %p159_p9 }
   0xe   : > { %p186_p11 = scmp.lt.s32.totalorder (!%p160_p10), %s635_s15, 1  ;;  %s183_s30 = sand.u32 (!%p160_p10), 1, %s627_s13  }
   0xf   : > { %163 = sbr.rel (%p160_p10) target bundleno = 275 (0x113), region = 32  ;;  %s453_s4 = sshll.u32 (!%p160_p10), %s183_s30, 5 }
  0x10   : > { %s185_s5 = scalar_lea.vmem (!%p160_p10), [#allocation2], %s453_s4  ;;  %s646_s18 = smov (!%p160_p10), [#allocation2]  }
  0x11   : > { %s370_s6 = sshll.u32 (!%p160_p10), %s185_s5, 4  ;;  %s571_s19 = sshll.u32 (!%p160_p10), %s646_s18, 4  ;;  %s765_s6 = int_to_ptr.vmem [resolvable:$true] %s370_s6  ;;  %s572_s19 = int_to_ptr.vmem [resolvable:$false] %s571_s19 }
  0x12   : > { %s573_s21 = scalar_lea.vmem (!%p160_p10), %s572_s19, 1024  ;;  %p574_p1 = scmp.lt.s32.totalorder (!%p160_p10), %s765_s6, %s572_s19 }
  0x14   : > { %v194_v0 = vld [vmem:[%s816_s1] sm:$0xff]  ;;  %vm224_vm0 = vcmask 130048   ;;  %v196_v1 = vld [vmem:[%s816_s1 + $0x10] sm:$0xff]  ;;  %s187_s7 = scalar_select %p186_p11, %s635_s15, 1  ;;  %v645_v4 = vmov 0   ;;  %v195_v7 = vld [vmem:[%s816_s1 + $0x8] sm:$0xff] }
  0x15   : > { %481 = vmatprep.mubr.msk.f32.mxu0 %vm224_vm0, %v194_v0  ;;  %484 = vmatprep.mubr.msk.f32.mxu1 %vm224_vm0, %v196_v1  ;;  %v202_v2 = vld [vmem:[%s817_s2 + $0x10] sm:$0xff]  ;;  %v200_v3 = vld [vmem:[%s817_s2] sm:$0xff]  ;;  %v197_v8 = vld [vmem:[%s816_s1 + $0x18] sm:$0xff]  ;;  %vm350_vm1 = vcmask 523264  }
  0x16   : > { %550 = vset.pattern.permute.xlu1 %v645_v4  ;;  %549 = vset.pattern.permute.xlu0 %v645_v4  ;;  %s469_s8 = sshll.u32 %s187_s7, 4  ;;  %v203_v9 = vld [vmem:[%s817_s2 + $0x18] sm:$0xff]  ;;  %v201_v10 = vld [vmem:[%s817_s2 + $0x8] sm:$0xff]  ;;  %s470_s7 = sshll.u32 %s635_s15, 9 }
  0x17   : > { %216 = vperm.xlu1 %550, %v202_v2   ;;  %206 = vperm.xlu0 %549, %v200_v3   ;;  %s193_s11 = scalar_lea.vmem %s815_s0, %s469_s8  ;;  %s763_s10 = scalar_lea.hbm %s818_s3, %s470_s7 }
  0x18   : > { %v199_v5 = vld [vmem:[%s193_s11 + $0x8] sm:$0xff]  ;;  %v198_v6 = vld [vmem:[%s193_s11] sm:$0xff]  ;;  %s770_s15 = scalar_lea.sflag [#allocation3], %s183_s30  ;;  %s567_s11 = scalar_lea.vmem %s765_s6, 512 }
  0x19   : > { %477 = vmatprep.subr.mxu0 %v199_v5  ;;  %487 = vmatprep.subr.mxu1 %v199_v5  ;;  %p568_p12 = scmp.ne.s32.totalorder %s765_s6, %s567_s11  ;;  %p575_p2 = scmp.lt.s32.totalorder %s573_s21, %s567_s11 }
  0x1a   : > { %478 = vmatpush3.msra.mxu0 %v199_v5  ;;  %489 = vmatpush3.msra.mxu1 %v199_v5 }
  0x1b   : > { %479 = vmatprep.subr.mxu0 %v198_v6  ;;  %488 = vmatprep.subr.mxu1 %v198_v6  ;;  %p569_p13 = pnand %p568_p12, %p709_p4  ;;  %p576_p3 = por %p575_p2, %p574_p1 }
  0x1c   : > { %480 = vmatpush3.msra.mxu0 %v198_v6  ;;  %490 = vmatpush3.msra.mxu1 %v198_v6 }
  0x1d   : > { %482 = vmatmul.mubr.msk.f32.vlgmr.msra.gmra.mxu0 %vm224_vm0, %v195_v7  ;;  %485 = vmatmul.mubr.msk.f32.vlgmr.msra.gmra.mxu1 %vm224_vm0, %v197_v8  ;;  %p570_p0 = pneg %p569_p13 }
  0x1e   : > { %221 = vperm.xlu1 %550, %v203_v9   ;;  %211 = vperm.xlu0 %549, %v201_v10  }
  0x1f   : > { %p577_p5 = pnand %p576_p3, %p570_p0 }
  0x92   : > { %v217_v11 = vpop.permute.xlu1 %216  ;;  %v207_v12 = vpop.permute.xlu0 %206 }
  0x99   : > { %v222_v13 = vpop.permute.xlu1 %221  ;;  %v212_v14 = vpop.permute.xlu0 %211 }
  0xdd   : > { %v483_v15 = vpop.f32.mrf.mxu0  ;;  %v486_v16 = vpop.f32.mrf.mxu1 }
  0xde   : > { %v309_v17 = vadd.f32 %v483_v15, %v212_v14  ;;  %v319_v18 = vadd.f32 %v486_v16, %v222_v13 }
  0xdf   : > { %v303_v19 = vpop.f32.mrf.mxu0  ;;  %v313_v20 = vpop.f32.mrf.mxu1 }
  0xe0   : > { %v461_v21 = vmul.f32 -1.442695, %v309_v17  ;;  %v463_v22 = vmul.f32 -1.442695, %v319_v18  ;;  %v304_v23 = vadd.f32 %v303_v19, %v207_v12  ;;  %v314_v24 = vadd.f32 %v313_v20, %v217_v11 }
  0xe2   : > { %551 = vpow2.f32 %v461_v21  ;;  %v460_v25 = vmul.f32 -1.442695, %v304_v23  ;;  %v462_v26 = vmul.f32 -1.442695, %v314_v24 }
  0xe3   : > { %553 = vpow2.f32 %v463_v22 }
  0xe4   : > { %555 = vpow2.f32 %v460_v25 }
  0xe5   : > { %557 = vpow2.f32 %v462_v26 }
  0xef   : > { %v552_v27 = vpop.eup %551 }
  0xf0   : > { %v554_v28 = vpop.eup %553  ;;  %v335_v29 = vadd.f32 1.0, %v552_v27 }
  0xf1   : > { %v556_v30 = vpop.eup %555  ;;  %v337_v31 = vadd.f32 1.0, %v554_v28 }
  0xf2   : > { %v558_v32 = vpop.eup %557  ;;  %559 = vrcp.f32 %v335_v29  ;;  %v334_v33 = vadd.f32 1.0, %v556_v30 }
  0xf3   : > { %561 = vrcp.f32 %v337_v31  ;;  %v336_v34 = vadd.f32 1.0, %v558_v32 }
  0xf4   : > { %563 = vrcp.f32 %v334_v33 }
  0xf5   : > { %565 = vrcp.f32 %v336_v34 }
  0xff   : > { %v560_v35 = vpop.eup %559 }
 0x100   : > { %v562_v36 = vpop.eup %561  ;;  %v347_v37 = vmul.f32 %v560_v35, %v309_v17 }
 0x101   : > { %v564_v38 = vpop.eup %563  ;;  %v349_v39 = vmul.f32 %v562_v36, %v319_v18 }
 0x102   : > { %v566_v40 = vpop.eup %565  ;;  %352 = vst.msk [vmem:[%s185_s5 + $0x8] sm:$0xff] %vm350_vm1, %v347_v37  ;;  %v346_v41 = vmul.f32 %v564_v38, %v304_v23 }
 0x103   : > { %354 = vst.msk [vmem:[%s185_s5 + $0x18] sm:$0xff] %vm350_vm1, %v349_v39  ;;  %v348_v42 = vmul.f32 %v566_v40, %v314_v24 }
 0x104   : > { %351 = vst.msk [vmem:[%s185_s5] sm:$0xff] %vm350_vm1, %v346_v41 }
 0x105   : > { %353 = vst.msk [vmem:[%s185_s5 + $0x10] sm:$0xff] %vm350_vm1, %v348_v42 }
 0x106   : > { %580 = shalt.err (!%p577_p5)
}
 0x107   : > { %s581_s23 = scalar_lea.hbm %s763_s10, 512  ;;  %s585_s28 = scalar_lea.hbm %s818_s3, 1024 }
 0x108   : > { %p582_p6 = scmp.ne.s32.totalorder %s763_s10, %s581_s23  ;;  %p586_p10 = scmp.lt.s32.totalorder %s763_s10, %s818_s3 }
 0x109   : > { %p587_p11 = scmp.lt.s32.totalorder %s585_s28, %s581_s23 }
 0x10a   : > { %p583_p7 = pnand %p582_p6, %p709_p4 }
 0x10b   : > { %p588_p12 = por %p587_p11, %p586_p10 }
 0x10c   : > { %p584_p9 = pneg %p583_p7 }
 0x10e   : > { %p589_p13 = pnand %p588_p12, %p584_p9 }
 0x110   : > { %592 = shalt.err (!%p589_p13)
}
 0x111   : > { %s647_s4 = smov 128   ;;  %s648_s5 = smov 8  }
 0x112   : > { %491 = dma.vmem_to_hbm [thread:$0]  (%p709_p4), %s765_s6, 512, %s763_s10, %s770_s15, %s647_s4, %s647_s4, %s648_s5  }
 0x113 PF: > { %p497_p0 = scmp.ge.s32.totalorder %s643_s17, 2  ;;  %s385_s7 = sand.u32 1, %s623_s12  }
 0x114   : > { %s386_s8 = scalar_lea.sflag [#allocation3], %s385_s7 }
 0x115   : > { %p494_p1 = pnand %p497_p0, %p716_p8 }
 0x117   : > { %p495_p2 = pneg %p494_p1 }
 0x119   : > { %618 = dma.done.wait (%p495_p2), %s386_s8, 512  }
 0x11a   : > { %620 = vsyncadd (%p495_p2), %s386_s8, 4294966784  ;;  %s16_s17 = sadd.s32 1, %s643_s17   ;;  %s821_s12 = smov %s627_s13 }
 0x11b   : > { %p13_p3 = scmp.ge.s32.totalorder %s16_s17, 4   ;;  %s822_s13 = smov %s631_s14 }
 0x11c   : > { %s823_s14 = smov %s722_s25  ;;  %s824_s15 = smov %s639_s16 }
 0x11d   : > { %s825_s16 = smov %s827_s20  ;;  %15 = sbr.rel (!%p13_p3) target bundleno = 4 (0x4), region = 67 }
 0x122   :  { %391 = vsyncpa [#allocation3], 1 }
 0x123   :  { %393 = vsyncpa [#allocation3 + $0x1], 1 }

</bundles_post_ra>
